<compile_context>
chip_gen: v5e
topology: v5e:2x2
jax: 0.10.0
libtpu: 0.0.40
codegen_flags: <defaults>
</compile_context>

<pallas_src>
import jax
import jax.numpy as jnp
from jax.experimental import pallas as pl
from jax.experimental.pallas import tpu as pltpu


def _critic_head_kernel(x_ref, w_ref, b_ref, o_ref):
    """One batch tile: o[TILE_B, 1] = x.astype(param_dtype) @ w[H, 1] + b."""
    param_dtype = w_ref.dtype
    x = x_ref[...].astype(param_dtype)            # x.to(self._use_type)
    acc = jnp.dot(x, w_ref[...], preferred_element_type=jnp.float32)
    o_ref[...] = (acc + b_ref[0]).astype(o_ref.dtype)   # scalar f32 bias (SMEM)


def _round_up(x, m):
    return ((x + m - 1) // m) * m


def _vmem_capacity_bytes():
    try:
        return int(pltpu.get_tpu_info().vmem_capacity_bytes)
    except Exception:
        return 64 * 1024 * 1024          # conservative fallback (v7x per-TC)


def _choose_tile(B, H, itemsize, vmem_capacity):
    """Pick rows of x per grid step + a vmem limit, per TPU generation."""
    g = max(8, 32 // itemsize)                      # sublane granularity
    row_bytes = H * itemsize
    if vmem_capacity >= 100 * 1024 * 1024:          # v5e / v6e (128 MiB VMEM)
        xbuf_budget = 40 * 1024 * 1024
        vmem_limit = 80 * 1024 * 1024
    else:                                           # v7x (64 MiB per TC)
        xbuf_budget = 20 * 1024 * 1024
        vmem_limit = 40 * 1024 * 1024
    # Target ~8 MiB of x per grid step to amortize per-step overhead.
    target_rows = pl.cdiv(8 * 1024 * 1024, row_bytes)
    # Double-buffered x must fit the budget (cast temp / out buffers live in
    # the headroom between xbuf_budget and vmem_limit).
    max_rows_vmem = max(g, (xbuf_budget // (2 * row_bytes)) // g * g)
    tile = min(target_rows, max_rows_vmem, _round_up(B, g))
    tile = max(g, (tile // g) * g)
    # Guarantee >= 2 grid steps for mid/large batches so ("parallel",) can
    # shard tiles across both v7x TensorCores (no-op on single-TC v5e/v6e).
    if tile >= B and B > 256:
        tile = min(tile, _round_up(pl.cdiv(B, 2), 128))
    # Re-clamp against the VMEM-derived cap after any rounding (review item).
    tile = min(tile, max_rows_vmem)
    tile = max(g, (tile // g) * g)
    return tile, vmem_limit


def linear_critic_head(x, weight, bias, *, tile_b=None, force_kernel=False,
                       min_kernel_bytes=1 << 20):
    """x: [B, H] (any float dtype); weight: [1, H]; bias: [1, 1] or [1].
    Returns [B, 1] in the parameter dtype (== fc(x.to(use_type)))."""
    B, H = x.shape
    out_dtype = weight.dtype
    itemsize = jnp.dtype(x.dtype).itemsize

    # Small-problem fast path: pallas_call fixed overhead would dominate.
    if not force_kernel and B * H * itemsize <= min_kernel_bytes:
        xw = jnp.dot(x.astype(out_dtype), weight.astype(out_dtype).T,
                     preferred_element_type=jnp.float32)
        return (xw + jnp.asarray(bias, jnp.float32).reshape(1, 1)).astype(out_dtype)

    # [1, H] -> [H, 1] keeps element order (it IS the transpose of one row),
    # so the kernel needs no transpose of either operand.
    w_col = weight.reshape(H, 1)
    bias_f32 = jnp.asarray(bias, dtype=jnp.float32).reshape((1,))

    vmem_capacity = _vmem_capacity_bytes()
    if tile_b is None:
        tile, vmem_limit = _choose_tile(B, H, itemsize, vmem_capacity)
    else:
        g = max(8, 32 // itemsize)
        tile = max(g, (min(int(tile_b), _round_up(B, g)) // g) * g)
        vmem_limit = (40 if vmem_capacity < 100 * 1024 * 1024 else 80) * 1024 * 1024
    num_tiles = pl.cdiv(B, tile)     # ragged boundary block is masked on store

    cost = pl.CostEstimate(
        flops=2 * B * H,
        transcendentals=0,
        bytes_accessed=B * H * itemsize
        + H * jnp.dtype(out_dtype).itemsize
        + B * jnp.dtype(out_dtype).itemsize,
    )

    return pl.pallas_call(
        _critic_head_kernel,
        out_shape=jax.ShapeDtypeStruct((B, 1), out_dtype),
        grid=(num_tiles,),
        in_specs=[
            pl.BlockSpec((tile, H), lambda i: (i, 0)),           # stream x tiles
            pl.BlockSpec((H, 1), lambda i: (0, 0)),              # resident weight
            pl.BlockSpec(memory_space=pltpu.MemorySpace.SMEM),   # scalar bias
        ],
        out_specs=pl.BlockSpec((tile, 1), lambda i: (i, 0)),
        compiler_params=pltpu.CompilerParams(
            dimension_semantics=("parallel",),   # v7x: shard batch tiles on 2 TCs
            vmem_limit_bytes=vmem_limit,
        ),
        cost_estimate=cost,
    )(x, w_col, bias_f32)


def init_linear_critic_head_params(key, input_size, use_b16: bool):
    """Mirror the module init: nn.init.orthogonal_ on a (1, input_size) weight
    == unit-norm row; bias = 0; optionally cast params to bfloat16 (use_b16)."""
    v = jax.random.normal(key, (1, input_size), dtype=jnp.float32)
    w = v / jnp.linalg.norm(v)
    b = jnp.zeros((1, 1), dtype=jnp.float32)
    use_type = jnp.bfloat16 if use_b16 else jnp.float32
    return w.astype(use_type), b.astype(use_type)


if __name__ == "__main__":
    key = jax.random.PRNGKey(0)
    k_w, k_x, k_x2, k_x3 = jax.random.split(key, 4)

    # Case 1: bf16 params, small shapes (B=8, H=32), Pallas path forced.
    B, H = 8, 32
    weight, bias = init_linear_critic_head_params(k_w, H, use_b16=True)
    x = jax.random.normal(k_x, (B, H), dtype=jnp.float32)
    out = jax.block_until_ready(linear_critic_head(x, weight, bias, force_kernel=True))
    ref = (x.astype(weight.dtype) @ weight.T).astype(jnp.float32) + bias.astype(jnp.float32)
    assert out.shape == (B, 1), out.shape
    assert out.dtype == jnp.bfloat16, out.dtype
    assert jnp.allclose(out.astype(jnp.float32), ref, atol=1e-2, rtol=1e-2)

    # Case 2: f32 params, ragged batch (B=20), forced tile of 8 -> 3 grid
    # steps with a masked boundary block and NO wrapper-side padding.
    B2 = 20
    weight2, bias2 = init_linear_critic_head_params(k_w, H, use_b16=False)
    x2 = jax.random.normal(k_x2, (B2, H), dtype=jnp.float32)
    out2 = jax.block_until_ready(
        linear_critic_head(x2, weight2, bias2, tile_b=8, force_kernel=True))
    ref2 = x2 @ weight2.T + bias2
    assert out2.shape == (B2, 1), out2.shape
    assert out2.dtype == jnp.float32, out2.dtype
    assert jnp.allclose(out2, ref2, atol=1e-5, rtol=1e-5)

    # Case 3: auto tiling (B=300 > 256 triggers the >=2-tile split), ragged
    # last tile, f32 params.
    B3, H3 = 300, 512
    weight3, bias3 = init_linear_critic_head_params(k_w, H3, use_b16=False)
    x3 = jax.random.normal(k_x3, (B3, H3), dtype=jnp.float32)
    out3 = jax.block_until_ready(
        linear_critic_head(x3, weight3, bias3, force_kernel=True))
    ref3 = jnp.dot(x3, weight3.T, precision=jax.lax.Precision.HIGHEST) + bias3
    assert out3.shape == (B3, 1), out3.shape
    assert jnp.allclose(out3, ref3, atol=2e-2, rtol=2e-2)

    # Case 4: small-problem fast path (plain XLA, no kernel) still matches.
    out4 = jax.block_until_ready(linear_critic_head(x, weight, bias))
    assert out4.shape == (B, 1) and out4.dtype == jnp.bfloat16
    assert jnp.allclose(out4.astype(jnp.float32), ref, atol=1e-2, rtol=1e-2)

    print("KERNEL_OK")
</pallas_src>

<mosaic_0001>
module attributes {stable_mosaic.version = 11 : i64} {
  func.func @_critic_head_kernel(%arg0: i32, %arg1: memref<8x32xf32, #tpu.memory_space<vmem>>, %arg2: memref<32x1xbf16, #tpu.memory_space<vmem>>, %arg3: memref<1xf32, #tpu.memory_space<smem>>, %arg4: memref<8x1xbf16, #tpu.memory_space<vmem>>) attributes {dimension_semantics = [#tpu.dimension_semantics<parallel>], iteration_bounds = array<i64: 1>, scalar_prefetch = 0 : i64, scratch_operands = 0 : i64, tpu.core_type = #tpu.core_type<tc>, window_params = [{transform_indices = @transform_0, window_bounds = array<i64: 8, 32>}, {pipeline_mode = #tpu.pipeline_mode<synchronous>, transform_indices = @transform_1, window_bounds = array<i64: 32, 1>}, {transform_indices = @transform_2, window_bounds = array<i64: 1>}, {transform_indices = @transform_3, window_bounds = array<i64: 8, 1>}]} {
    %c0 = arith.constant 0 : index
    %c0_0 = arith.constant 0 : index
    %0 = vector.load %arg1[%c0, %c0_0] : memref<8x32xf32, #tpu.memory_space<vmem>>, vector<8x32xf32>
    %1 = arith.truncf %0 : vector<8x32xf32> to vector<8x32xbf16>
    %c0_1 = arith.constant 0 : index
    %c0_2 = arith.constant 0 : index
    %2 = vector.load %arg2[%c0_1, %c0_2] : memref<32x1xbf16, #tpu.memory_space<vmem>>, vector<32x1xbf16>
    %cst = arith.constant dense<0.000000e+00> : vector<8x1xf32>
    %3 = tpu.matmul %1, %2, %cst {dimension_numbers = #tpu.dot_dimension_numbers<[1], [0], [0], [1], [0, 0, 1, 1], [], []>} : vector<8x32xbf16>, vector<32x1xbf16>, vector<8x1xf32> -> vector<8x1xf32>
    %c0_3 = arith.constant 0 : index
    %4 = memref.load %arg3[%c0_3] : memref<1xf32, #tpu.memory_space<smem>>
    %5 = vector.broadcast %4 : f32 to vector<8x1xf32>
    %6 = arith.addf %3, %5 : vector<8x1xf32>
    %7 = arith.truncf %6 : vector<8x1xf32> to vector<8x1xbf16>
    %c0_4 = arith.constant 0 : index
    %c0_5 = arith.constant 0 : index
    %8 = vector.load %arg4[%c0_4, %c0_5] : memref<8x1xbf16, #tpu.memory_space<vmem>>, vector<8x1xbf16>
    tpu.vector_store %arg4[%c0_4, %c0_5], %7 {strides = array<i32>} : memref<8x1xbf16, #tpu.memory_space<vmem>>, vector<8x1xbf16>,
    return
  }
  func.func @transform_0(%arg0: i32) -> (i32, i32) {
    %c0_i32 = arith.constant 0 : i32
    %c0_i32_0 = arith.constant 0 : i32
    return %arg0, %c0_i32 : i32, i32
  }
  func.func @transform_1(%arg0: i32) -> (i32, i32) {
    %c0_i32 = arith.constant 0 : i32
    %c0_i32_0 = arith.constant 0 : i32
    %c0_i32_1 = arith.constant 0 : i32
    return %c0_i32, %c0_i32_0 : i32, i32
  }
  func.func @transform_2(%arg0: i32) -> i32 {
    %c0_i32 = arith.constant 0 : i32
    %c0_i32_0 = arith.constant 0 : i32
    return %c0_i32 : i32
  }
  func.func @transform_3(%arg0: i32) -> (i32, i32) {
    %c0_i32 = arith.constant 0 : i32
    %c0_i32_0 = arith.constant 0 : i32
    return %arg0, %c0_i32 : i32, i32
  }
}

</mosaic_0001>

<bundles_post_ra>
// kernel: tpu_custom_call.1
= control target key start
LH: loop header
LB: loop body
LE: loop exit
PB: predicated region body
PF: predicated region fallthrough
CT: control target
= control target key end

     0   :  { %vm36_vm0 = vcmask 261120   ;;  %vm54_vm1 = vcmask 3072   ;;  %s106_s1 = inlined_call_operand.vmem [shape: bf16[32,1], index: 1, kind: input, shape index: {}]   ;;  %s107_s0 = inlined_call_operand.vmem [shape: f32[8,32], index: 0, kind: input, shape index: {}]   ;;  %s108_s2 = inlined_call_operand.<no memory space> [shape: f32[1], index: 2, kind: input, shape index: {}]   ;;  %s109_s3 = inlined_call_operand.vmem [shape: bf16[8,1], index: 3, kind: output, shape index: {}]  }
   0x1   :  { %v70_v0 = vld [vmem:[%s106_s1 + $0x8] sm:$0xff]  ;;  %v69_v1 = vld [vmem:[%s106_s1] sm:$0xff]  ;;  %v23_v4 = vstv %s108_s2 }
   0x2   :  { %46 = vmatpush.bf16.msra.mxu0 %v70_v0  ;;  %v16_v2 = vld [vmem:[%s107_s0] sm:$0xff] }
   0x3   :  { %v17_v3 = vpack.c.bf16 %v16_v2, %v16_v2 }
   0x6   :  { %47 = vmatpush.bf16.msra.mxu0 %v69_v1 }
   0x9   :  { %68 = vmatmul.msk.bf16.vlgmr.msra.gmra.mxu0 %vm36_vm0, %v17_v3 }
  0x86   :  { %v49_v5 = vpop.f32.mrf.mxu0 }
  0x87   :  { %v50_v6 = vadd.f32 %v49_v5, %v23_v4 }
  0x89   :  { %v53_v7 = vpack.c.bf16 %v50_v6, %v50_v6 }
  0x8b   :  { %55 = vst.msk [vmem:[%s109_s3] sm:$0xf] %vm54_vm1, %v53_v7 }
  0x8e   :  { %v51_v8 = vpop.f32.mrf.mxu0 }

</bundles_post_ra>
